<compile_context>
chip_gen: v7x
topology: tpu7x:2x2x1
jax: 0.10.0
libtpu: 0.0.40
codegen_flags: <defaults>
</compile_context>

<pallas_src>
import jax
import jax.numpy as jnp
from jax.experimental import pallas as pl
from jax.experimental.pallas import tpu as pltpu

_LANES = 128
_SUBLANES = 8


def _kld_partial_kernel(mu_ref, lv_ref, out_ref):
    mu = mu_ref[...].astype(jnp.float32)
    lv = lv_ref[...].astype(jnp.float32)
    # Hot loop: exp -> EUP slot, mul/sub/add -> VPU; no intermediates stored.
    elem = 1.0 + lv - mu * mu - jnp.exp(lv)
    # (tile_rows, 128) -> (tile_rows/8, 8, 128) is layout-preserving (groups
    # whole vregs); sum(axis=0) is elementwise vreg adds (no XLU in hot path).
    partial = elem.reshape(-1, _SUBLANES, _LANES).sum(axis=0)
    out_ref[0] = partial


def _round_up(x, m):
    return ((x + m - 1) // m) * m


def kld_loss(mu, logvar, *, target_block_bytes=1 << 20):
    """Pallas TPU implementation of KLDLoss.forward(mu, logvar) -> scalar."""
    assert mu.shape == logvar.shape and mu.ndim == 2
    B, D = mu.shape
    N = B * D
    itemsize = jnp.dtype(mu.dtype).itemsize

    # Lane-dense layout: rows of 128 lanes.
    rows = pl.cdiv(N, _LANES)
    # ~1 MiB per input block (bandwidth-bound), rows a multiple of 8.
    tile_rows = max(
        _SUBLANES,
        (target_block_bytes // (_LANES * itemsize)) // _SUBLANES * _SUBLANES,
    )
    tile_rows = min(tile_rows, _round_up(rows, _SUBLANES))
    rows_pad = _round_up(rows, tile_rows)
    n_pad = rows_pad * _LANES
    num_tiles = rows_pad // tile_rows

    def _prep(x):
        flat = x.reshape(-1)
        if n_pad != N:
            # Zero padding contributes 1 + 0 - 0 - exp(0) = 0 exactly.
            flat = jnp.pad(flat, (0, n_pad - N))
        return flat.reshape(rows_pad, _LANES)

    mu2d = _prep(mu)
    lv2d = _prep(logvar)

    # Explicit VMEM budget: 2 inputs x 2 pipeline buffers x tile + small outputs.
    vmem_bytes = 4 * tile_rows * _LANES * itemsize + 4 * _SUBLANES * _LANES * 4
    vmem_bytes = int(min(max(2 * vmem_bytes, 1 << 20), 32 << 20))

    partials = pl.pallas_call(
        _kld_partial_kernel,
        out_shape=jax.ShapeDtypeStruct((num_tiles, _SUBLANES, _LANES), jnp.float32),
        grid_spec=pltpu.PrefetchScalarGridSpec(
            num_scalar_prefetch=0,
            grid=(num_tiles,),
            in_specs=[
                pl.BlockSpec((tile_rows, _LANES), lambda i: (i, 0)),
                pl.BlockSpec((tile_rows, _LANES), lambda i: (i, 0)),
            ],
            out_specs=pl.BlockSpec((1, _SUBLANES, _LANES), lambda i: (i, 0, 0)),
        ),
        compiler_params=pltpu.CompilerParams(
            # Independent per-tile partials -> shard grid across TCs on v7x.
            dimension_semantics=("parallel",),
            vmem_limit_bytes=vmem_bytes,
        ),
    )(mu2d, lv2d)

    # Tiny final reduction + scaling in plain JAX.
    return (-0.5 / B) * jnp.sum(partials)


def kld_loss_ref(mu, logvar):
    """Pure-JAX reference mirroring the PyTorch module."""
    per_sample = -0.5 * jnp.sum(
        1.0 + logvar - mu**2 - jnp.exp(logvar), axis=1
    )
    return jnp.mean(per_sample)


if __name__ == "__main__":
    key = jax.random.PRNGKey(0)

    # Case 1: small VAE-like shapes, D not a multiple of 128 (exercises the
    # lane-dense flatten + zero-pad path).
    k1, k2, k3, k4 = jax.random.split(key, 4)
    B1, D1 = 8, 32
    mu1 = jax.random.normal(k1, (B1, D1), dtype=jnp.float32)
    lv1 = 0.5 * jax.random.normal(k2, (B1, D1), dtype=jnp.float32)
    out1 = kld_loss(mu1, lv1)
    jax.block_until_ready(out1)
    ref1 = kld_loss_ref(mu1, lv1)
    assert jnp.allclose(out1, ref1, rtol=1e-5, atol=1e-5), (out1, ref1)

    # Case 2: D already lane-dense (no padding path).
    B2, D2 = 16, 128
    mu2 = jax.random.normal(k3, (B2, D2), dtype=jnp.float32)
    lv2 = 0.5 * jax.random.normal(k4, (B2, D2), dtype=jnp.float32)
    out2 = kld_loss(mu2, lv2)
    jax.block_until_ready(out2)
    ref2 = kld_loss_ref(mu2, lv2)
    assert jnp.allclose(out2, ref2, rtol=1e-5, atol=1e-5), (out2, ref2)

    print("KERNEL_OK")
</pallas_src>

<mosaic_0001>
module attributes {stable_mosaic.version = 11 : i64} {
  func.func @_kld_partial_kernel(%arg0: i32, %arg1: memref<8x128xf32, #tpu.memory_space<vmem>>, %arg2: memref<8x128xf32, #tpu.memory_space<vmem>>, %arg3: memref<1x8x128xf32, #tpu.memory_space<vmem>>) attributes {dimension_semantics = [#tpu.dimension_semantics<parallel>], iteration_bounds = array<i64: 1>, scalar_prefetch = 0 : i64, scratch_operands = 0 : i64, tpu.core_type = #tpu.core_type<tc>, window_params = [{transform_indices = @transform_0, window_bounds = array<i64: 8, 128>}, {transform_indices = @transform_1, window_bounds = array<i64: 8, 128>}, {transform_indices = @transform_2, window_bounds = array<i64: 1, 8, 128>}]} {
    %c0 = arith.constant 0 : index
    %c0_0 = arith.constant 0 : index
    %0 = vector.load %arg1[%c0, %c0_0] : memref<8x128xf32, #tpu.memory_space<vmem>>, vector<8x128xf32>
    %c0_1 = arith.constant 0 : index
    %c0_2 = arith.constant 0 : index
    %1 = vector.load %arg2[%c0_1, %c0_2] : memref<8x128xf32, #tpu.memory_space<vmem>>, vector<8x128xf32>
    %cst = arith.constant 1.000000e+00 : f32
    %2 = vector.broadcast %cst : f32 to vector<8x128xf32>
    %3 = arith.addf %2, %1 : vector<8x128xf32>
    %4 = arith.mulf %0, %0 : vector<8x128xf32>
    %5 = arith.subf %3, %4 : vector<8x128xf32>
    %6 = math.exp %1 : vector<8x128xf32>
    %7 = arith.subf %5, %6 : vector<8x128xf32>
    %8 = vector.shape_cast %7 : vector<8x128xf32> to vector<1x8x128xf32>
    %cst_3 = arith.constant dense<0.000000e+00> : vector<8x128xf32>
    %9 = vector.multi_reduction <add>, %8, %cst_3 [0] : vector<1x8x128xf32> to vector<8x128xf32>
    %c0_4 = arith.constant 0 : index
    %c0_5 = arith.constant 0 : index
    %c0_6 = arith.constant 0 : index
    %10 = vector.load %arg3[%c0_4, %c0_5, %c0_6] : memref<1x8x128xf32, #tpu.memory_space<vmem>>, vector<1x8x128xf32>
    %11 = vector.shape_cast %10 : vector<1x8x128xf32> to vector<8x128xf32>
    %12 = vector.shape_cast %9 : vector<8x128xf32> to vector<1x8x128xf32>
    tpu.vector_store %arg3[%c0_4, %c0_5, %c0_6], %12 {strides = array<i32>} : memref<1x8x128xf32, #tpu.memory_space<vmem>>, vector<1x8x128xf32>,
    return
  }
  func.func @transform_0(%arg0: i32) -> (i32, i32) {
    %c0_i32 = arith.constant 0 : i32
    %c0_i32_0 = arith.constant 0 : i32
    return %arg0, %c0_i32 : i32, i32
  }
  func.func @transform_1(%arg0: i32) -> (i32, i32) {
    %c0_i32 = arith.constant 0 : i32
    %c0_i32_0 = arith.constant 0 : i32
    return %arg0, %c0_i32 : i32, i32
  }
  func.func @transform_2(%arg0: i32) -> (i32, i32, i32) {
    %c0_i32 = arith.constant 0 : i32
    %c0_i32_0 = arith.constant 0 : i32
    %c0_i32_1 = arith.constant 0 : i32
    return %arg0, %c0_i32, %c0_i32_0 : i32, i32, i32
  }
}

</mosaic_0001>

<bundles_post_ra>
// kernel: tpu_custom_call.1
= control target key start
LH: loop header
LB: loop body
LE: loop exit
PB: predicated region body
PF: predicated region fallthrough
CT: control target
= control target key end

     0   :  { %7 = vsyncpa [#allocation3], 0  ;;  %s193_s0 = inlined_call_operand.hbm [shape: f32[8,128], index: 0, kind: input, shape index: {}]   ;;  %s194_s1 = inlined_call_operand.hbm [shape: f32[8,128], index: 1, kind: input, shape index: {}]   ;;  %s195_s2 = inlined_call_operand.hbm [shape: f32[1,8,128], index: 2, kind: output, shape index: {}]  }
   0x1   :  { %8 = vsyncpa [#allocation6], 0 }
   0x2   :  { %9 = vsyncpa [#allocation4], 0  ;;  %s139_s9 = smov [#allocation2]   ;;  %s140_s11 = smov [#allocation5]  }
   0x3   :  { %s16_s10 = sshll.u32 %s139_s9, 4  ;;  %s26_s12 = sshll.u32 %s140_s11, 4  ;;  %s17_s10 = int_to_ptr.vmem [resolvable:$true] %s16_s10  ;;  %s27_s12 = int_to_ptr.vmem [resolvable:$true] %s26_s12 }
   0x4   :  { %s67_s15 = scalar_lea.hbm %s193_s0, 128 }
   0x5   :  { %p68_p0 = scmp.ne.s32.totalorder %s193_s0, %s67_s15  ;;  %p71_p1 = scmp.lt.u32.totalorder %s67_s15, %s193_s0 }
   0x7   :  { %p73_p2 = pnand %p71_p1, %p68_p0 }
   0x9   :  { %76 = shalt.err (!%p73_p2)
}
   0xa   :  { %s77_s20 = scalar_lea.vmem %s17_s10, 128  ;;  %p82_p4 = scmp.lt.s32.totalorder %s17_s10, %s17_s10 }
   0xb   :  { %p78_p3 = scmp.ne.s32.totalorder %s17_s10, %s77_s20  ;;  %p83_p5 = scmp.lt.s32.totalorder %s77_s20, %s77_s20 }
   0xd   :  { %p84_p6 = por %p83_p5, %p82_p4 }
   0xf   :  { %p85_p7 = pnand %p84_p6, %p78_p3 }
  0x11   :  { %88 = shalt.err (!%p85_p7)
}
  0x12   :  { %19 = dma.hbm_to_vmem [thread:$0]  %s193_s0, 128, %s17_s10, [#allocation3]  }
  0x13   :  { %s89_s25 = scalar_lea.hbm %s194_s1, 128 }
  0x14   :  { %p90_p8 = scmp.ne.s32.totalorder %s194_s1, %s89_s25  ;;  %p93_p9 = scmp.lt.u32.totalorder %s89_s25, %s194_s1 }
  0x16   :  { %p95_p10 = pnand %p93_p9, %p90_p8 }
  0x18   :  { %98 = shalt.err (!%p95_p10)
}
  0x19   :  { %s99_s30 = scalar_lea.vmem %s27_s12, 128  ;;  %p104_p12 = scmp.lt.s32.totalorder %s27_s12, %s27_s12 }
  0x1a   :  { %p100_p11 = scmp.ne.s32.totalorder %s27_s12, %s99_s30  ;;  %p105_p13 = scmp.lt.s32.totalorder %s99_s30, %s99_s30 }
  0x1c   :  { %p106_p0 = por %p105_p13, %p104_p12 }
  0x1e   :  { %p107_p1 = pnand %p106_p0, %p100_p11 }
  0x20   :  { %110 = shalt.err (!%p107_p1)
}
  0x21   :  { %29 = dma.hbm_to_vmem [thread:$0]  %s194_s1, 128, %s27_s12, [#allocation6]  }
  0x22   :  { %133 = dma.done.wait [#allocation3], 128  }
  0x23   :  { %134 = vsyncadd [#allocation3], 4294967168 }
  0x24   :  { %135 = dma.done.wait [#allocation6], 128  }
  0x25   :  { %136 = vsyncadd [#allocation6], 4294967168  ;;  %v37_v0 = vld [vmem:[#allocation5] sm:$0xff]  ;;  %v36_v2 = vld [vmem:[#allocation2] sm:$0xff]  ;;  %s141_s4 = smov [#allocation7]  }
  0x26   :  { %v41_v1 = vmul.f32 1.442695, %v37_v0  ;;  %v38_v3 = vadd.f32 1.0, %v37_v0  ;;  %v39_v4 = vmul.f32 %v36_v2, %v36_v2  ;;  %s52_s5 = sshll.u32 %s141_s4, 4  ;;  %s53_s5 = int_to_ptr.vmem [resolvable:$true] %s52_s5 }
  0x27   :  { %s111_s6 = scalar_lea.vmem %s53_s5, 128  ;;  %p116_p3 = scmp.lt.s32.totalorder %s53_s5, %s53_s5 }
  0x28   :  { %65 = vpow2.f32 %v41_v1  ;;  %v40_v5 = vsub.f32 %v38_v3, %v39_v4  ;;  %p112_p2 = scmp.ne.s32.totalorder %s53_s5, %s111_s6  ;;  %p117_p4 = scmp.lt.s32.totalorder %s111_s6, %s111_s6 }
  0x2a   :  { %p118_p5 = por %p117_p4, %p116_p3 }
  0x2c   :  { %p119_p6 = pnand %p118_p5, %p112_p2 }
  0x32   :  { %v66_v6 = vpop.eup %65 }
  0x33   :  { %v43_v7 = vsub.f32 %v40_v5, %v66_v6 }
  0x35   :  { %45 = vst [vmem:[#allocation7] sm:$0xff] %v43_v7 }
  0x36   :  { %122 = shalt.err (!%p119_p6)
}
  0x37   :  { %s123_s8 = scalar_lea.hbm %s195_s2, 128 }
  0x38   :  { %p124_p7 = scmp.ne.s32.totalorder %s195_s2, %s123_s8  ;;  %p127_p8 = scmp.lt.u32.totalorder %s123_s8, %s195_s2 }
  0x3a   :  { %p129_p9 = pnand %p127_p8, %p124_p7 }
  0x3c   :  { %132 = shalt.err (!%p129_p9)
}
  0x3d   :  { %55 = dma.vmem_to_hbm [thread:$0]  %s53_s5, 128, %s195_s2, [#allocation4]  }
  0x3e   :  { %137 = dma.done.wait [#allocation4], 128  }
  0x3f   :  { %138 = vsyncadd [#allocation4], 4294967168 }
  0x40   :  { %59 = vsyncpa [#allocation3], 1 }
  0x41   :  { %60 = vsyncpa [#allocation6], 1 }
  0x42   :  { %61 = vsyncpa [#allocation4], 1 }

</bundles_post_ra>
